<compile_context>
chip_gen: v5e
topology: v5e:2x2
jax: 0.10.0
libtpu: 0.0.40
codegen_flags: <defaults>
</compile_context>

<pallas_src>
import functools

import jax
import jax.numpy as jnp
from jax import lax
from jax.experimental import pallas as pl
from jax.experimental.pallas import tpu as pltpu

NUM_CLASSES = 10
SCALE = 2.0
DEFAULT_TILE_N = 1024        # 1024 rows * 512 B/row (lane-padded f32) = 0.5 MiB / buffer
_SMALL_N_THRESHOLD = 2048    # below this, launch overhead dwarfs the work -> pure JAX


def _round_up(x, m):
    return ((x + m - 1) // m) * m


def _mae_loss_kernel(pred_ref, labels_ref, out_ref, *,
                     n_valid, tile_n, num_classes, scale, mask_rows):
    i = pl.program_id(0)

    # Zero the scalar accumulator on the first tile.
    @pl.when(i == 0)
    def _init():
        out_ref[0, 0] = jnp.float32(0.0)

    pred = pred_ref[...].astype(jnp.float32)                    # (TILE_N, C)
    labels = labels_ref[...]                                    # (TILE_N, 1) int32

    # Numerically-stable softmax pieces, without materializing probabilities.
    m = jnp.max(pred, axis=1, keepdims=True)                    # (TILE_N, 1)
    e = jnp.exp(pred - m)                                       # (TILE_N, C)
    denom = jnp.sum(e, axis=1, keepdims=True)                   # (TILE_N, 1)

    col = lax.broadcasted_iota(jnp.int32, (tile_n, num_classes), 1)
    sel = jnp.sum(jnp.where(col == labels, e, 0.0),
                  axis=1, keepdims=True)                        # (TILE_N, 1)

    per_row = 1.0 - sel / denom                                 # (TILE_N, 1)

    if mask_rows:
        # Zero the contribution of padded rows (global row index >= N).
        row = lax.broadcasted_iota(jnp.int32, (tile_n, 1), 0) + i * tile_n
        per_row = jnp.where(row < n_valid, per_row, 0.0)

    out_ref[0, 0] += jnp.sum(per_row)

    # Finalize: one divide by N and one scale multiply, only on the last tile.
    @pl.when(i == pl.num_programs(0) - 1)
    def _finalize():
        out_ref[0, 0] = out_ref[0, 0] * jnp.float32(scale / n_valid)


def mae_loss_pallas(pred, labels, num_classes=NUM_CLASSES, scale=SCALE, tile_n=None):
    n, c = pred.shape
    assert c == num_classes
    labels2d = labels.astype(jnp.int32).reshape(n, 1)

    if tile_n is None:
        tile_n = DEFAULT_TILE_N
    tile_n = _round_up(min(tile_n, max(n, 8)), 8)
    n_pad = _round_up(n, tile_n)
    if n_pad != n:
        # Padded rows are masked out inside the kernel.
        pred = jnp.pad(pred, ((0, n_pad - n), (0, 0)))
        labels2d = jnp.pad(labels2d, ((0, n_pad - n), (0, 0)))
    num_tiles = n_pad // tile_n

    kernel = functools.partial(
        _mae_loss_kernel,
        n_valid=n, tile_n=tile_n, num_classes=num_classes, scale=scale,
        mask_rows=(n_pad != n))

    out = pl.pallas_call(
        kernel,
        grid=(num_tiles,),
        in_specs=[
            pl.BlockSpec((tile_n, num_classes), lambda i: (i, 0)),   # pred tile (VMEM)
            pl.BlockSpec((tile_n, 1), lambda i: (i, 0)),             # labels tile (VMEM)
        ],
        out_specs=pl.BlockSpec(memory_space=pltpu.MemorySpace.SMEM),  # (1,1) accumulator
        out_shape=jax.ShapeDtypeStruct((1, 1), jnp.float32),
        compiler_params=pltpu.CompilerParams(
            dimension_semantics=("arbitrary",)),   # reduction axis (scalar accumulator)
    )(pred, labels2d)
    return out[0, 0]


def mae_loss_ref(pred, labels, num_classes=NUM_CLASSES, scale=SCALE):
    p = jax.nn.softmax(pred.astype(jnp.float32), axis=1)
    oh = jax.nn.one_hot(labels, num_classes, dtype=jnp.float32)
    return scale * jnp.mean(1.0 - jnp.sum(oh * p, axis=1))


def mae_loss(pred, labels, num_classes=NUM_CLASSES, scale=SCALE):
    # Dispatch: for tiny batches the pallas_call launch overhead dominates; use plain JAX.
    if pred.shape[0] <= _SMALL_N_THRESHOLD:
        return mae_loss_ref(pred, labels, num_classes, scale)
    return mae_loss_pallas(pred, labels, num_classes, scale)


if __name__ == "__main__":
    k1, k2, k3, k4 = jax.random.split(jax.random.PRNGKey(0), 4)

    # Case 1: tiny batch, single tile (typical module usage shape).
    n1 = 8
    pred1 = jax.random.normal(k1, (n1, NUM_CLASSES), dtype=jnp.float32)
    labels1 = jax.random.randint(k2, (n1,), 0, NUM_CLASSES, dtype=jnp.int32)
    out1 = jax.block_until_ready(mae_loss_pallas(pred1, labels1))
    ref1 = mae_loss_ref(pred1, labels1)
    assert jnp.allclose(out1, ref1, atol=1e-5, rtol=1e-5), (out1, ref1)

    # Case 2: multi-tile grid with a masked, partially-filled last tile.
    n2 = 300
    pred2 = jax.random.normal(k3, (n2, NUM_CLASSES), dtype=jnp.float32)
    labels2 = jax.random.randint(k4, (n2,), 0, NUM_CLASSES, dtype=jnp.int32)
    out2 = jax.block_until_ready(mae_loss_pallas(pred2, labels2, tile_n=128))
    ref2 = mae_loss_ref(pred2, labels2)
    assert jnp.allclose(out2, ref2, atol=1e-5, rtol=1e-5), (out2, ref2)

    print("KERNEL_OK")
</pallas_src>

<mosaic_0001>
module attributes {stable_mosaic.version = 11 : i64} {
  func.func @_mae_loss_kernel(%arg0: i32, %arg1: memref<8x10xf32, #tpu.memory_space<vmem>>, %arg2: memref<8x1xi32, #tpu.memory_space<vmem>>, %arg3: memref<1x1xf32, #tpu.memory_space<smem>>) attributes {dimension_semantics = [#tpu.dimension_semantics<arbitrary>], iteration_bounds = array<i64: 1>, scalar_prefetch = 0 : i64, scratch_operands = 0 : i64, tpu.core_type = #tpu.core_type<tc>, window_params = [{transform_indices = @transform_0, window_bounds = array<i64: 8, 10>}, {transform_indices = @transform_1, window_bounds = array<i64: 8, 1>}, {transform_indices = @transform_2, window_bounds = array<i64: 1, 1>}]} {
    %c0_i32 = arith.constant 0 : i32
    %0 = arith.cmpi eq, %arg0, %c0_i32 : i32
    %1 = arith.extui %0 : i1 to i32
    %c0_i32_0 = arith.constant 0 : i32
    %2 = arith.cmpi ne, %1, %c0_i32_0 : i32
    scf.if %2 {
      %cst_15 = arith.constant 0.000000e+00 : f32
      %c0_16 = arith.constant 0 : index
      %c0_17 = arith.constant 0 : index
      %32 = memref.load %arg3[%c0_16, %c0_17] : memref<1x1xf32, #tpu.memory_space<smem>>
      memref.store %cst_15, %arg3[%c0_16, %c0_17] : memref<1x1xf32, #tpu.memory_space<smem>>
    } else {
    }
    %c0 = arith.constant 0 : index
    %c0_1 = arith.constant 0 : index
    %3 = vector.load %arg1[%c0, %c0_1] : memref<8x10xf32, #tpu.memory_space<vmem>>, vector<8x10xf32>
    %c0_2 = arith.constant 0 : index
    %c0_3 = arith.constant 0 : index
    %4 = vector.load %arg2[%c0_2, %c0_3] : memref<8x1xi32, #tpu.memory_space<vmem>>, vector<8x1xi32>
    %cst = arith.constant dense<0xFF800000> : vector<8xf32>
    %5 = vector.multi_reduction <maximumf>, %3, %cst [1] : vector<8x10xf32> to vector<8xf32>
    %6 = vector.shape_cast %5 : vector<8xf32> to vector<8x1xf32>
    %7 = vector.broadcast %6 : vector<8x1xf32> to vector<8x10xf32>
    %8 = arith.subf %3, %7 : vector<8x10xf32>
    %9 = math.exp %8 : vector<8x10xf32>
    %cst_4 = arith.constant dense<0.000000e+00> : vector<8xf32>
    %10 = vector.multi_reduction <add>, %9, %cst_4 [1] : vector<8x10xf32> to vector<8xf32>
    %11 = vector.shape_cast %10 : vector<8xf32> to vector<8x1xf32>
    %12 = tpu.iota {dimensions = array<i32: 1>} : vector<8x10xi32>
    %13 = vector.broadcast %4 : vector<8x1xi32> to vector<8x10xi32>
    %14 = arith.cmpi eq, %12, %13 : vector<8x10xi32>
    %cst_5 = arith.constant 0.000000e+00 : f32
    %15 = vector.broadcast %cst_5 : f32 to vector<8x10xf32>
    %16 = arith.select %14, %9, %15 : vector<8x10xi1>, vector<8x10xf32>
    %cst_6 = arith.constant dense<0.000000e+00> : vector<8xf32>
    %17 = vector.multi_reduction <add>, %16, %cst_6 [1] : vector<8x10xf32> to vector<8xf32>
    %18 = vector.shape_cast %17 : vector<8xf32> to vector<8x1xf32>
    %19 = arith.divf %18, %11 : vector<8x1xf32>
    %cst_7 = arith.constant 1.000000e+00 : f32
    %20 = vector.broadcast %cst_7 : f32 to vector<8x1xf32>
    %21 = arith.subf %20, %19 : vector<8x1xf32>
    %c0_8 = arith.constant 0 : index
    %c0_9 = arith.constant 0 : index
    %22 = memref.load %arg3[%c0_8, %c0_9] : memref<1x1xf32, #tpu.memory_space<smem>>
    %23 = vector.shape_cast %21 : vector<8x1xf32> to vector<1x8x1xf32>
    %cst_10 = arith.constant dense<0.000000e+00> : vector<1xf32>
    %24 = vector.multi_reduction <add>, %23, %cst_10 [1, 2] : vector<1x8x1xf32> to vector<1xf32>
    %25 = vector.shape_cast %24 : vector<1xf32> to vector<1x1x1xf32>
    %26 = vector.extract %25[0, 0, 0] : f32 from vector<1x1x1xf32>
    %27 = arith.addf %22, %26 : f32
    %c0_11 = arith.constant 0 : index
    %c0_12 = arith.constant 0 : index
    %28 = memref.load %arg3[%c0_11, %c0_12] : memref<1x1xf32, #tpu.memory_space<smem>>
    memref.store %27, %arg3[%c0_11, %c0_12] : memref<1x1xf32, #tpu.memory_space<smem>>
    %c0_i32_13 = arith.constant 0 : i32
    %29 = arith.cmpi eq, %arg0, %c0_i32_13 : i32
    %30 = arith.extui %29 : i1 to i32
    %c0_i32_14 = arith.constant 0 : i32
    %31 = arith.cmpi ne, %30, %c0_i32_14 : i32
    scf.if %31 {
      %c0_15 = arith.constant 0 : index
      %c0_16 = arith.constant 0 : index
      %32 = memref.load %arg3[%c0_15, %c0_16] : memref<1x1xf32, #tpu.memory_space<smem>>
      %cst_17 = arith.constant 2.500000e-01 : f32
      %33 = arith.mulf %32, %cst_17 : f32
      %c0_18 = arith.constant 0 : index
      %c0_19 = arith.constant 0 : index
      %34 = memref.load %arg3[%c0_18, %c0_19] : memref<1x1xf32, #tpu.memory_space<smem>>
      memref.store %33, %arg3[%c0_18, %c0_19] : memref<1x1xf32, #tpu.memory_space<smem>>
    } else {
    }
    return
  }
  func.func @transform_0(%arg0: i32) -> (i32, i32) {
    %c0_i32 = arith.constant 0 : i32
    %c0_i32_0 = arith.constant 0 : i32
    return %arg0, %c0_i32 : i32, i32
  }
  func.func @transform_1(%arg0: i32) -> (i32, i32) {
    %c0_i32 = arith.constant 0 : i32
    %c0_i32_0 = arith.constant 0 : i32
    return %arg0, %c0_i32 : i32, i32
  }
  func.func @transform_2(%arg0: i32) -> (i32, i32) {
    %c0_i32 = arith.constant 0 : i32
    %c0_i32_0 = arith.constant 0 : i32
    %c0_i32_1 = arith.constant 0 : i32
    return %c0_i32, %c0_i32_0 : i32, i32
  }
}

</mosaic_0001>

<bundles_post_ra>
// kernel: tpu_custom_call.1
= control target key start
LH: loop header
LB: loop body
LE: loop exit
PB: predicated region body
PF: predicated region fallthrough
CT: control target
= control target key end

     0   :  { %vm20_vm0 = vcmask 80896   ;;  %s145_s0 = inlined_call_operand.vmem [shape: f32[8,10], index: 0, kind: input, shape index: {}]   ;;  %s146_s1 = inlined_call_operand.vmem [shape: s32[8,1], index: 1, kind: input, shape index: {}]   ;;  %s147_s2 = inlined_call_operand.hbm [shape: f32[1,1], index: 2, kind: output, shape index: {}]  }
   0x1   :  { %v18_v0 = vld [vmem:[%s145_s0] sm:$0xff] }
   0x2   :  { %7 = vsyncpa [#allocation3], 0  ;;  %v21_v1 = vsel %vm20_vm0, %v18_v0, -inf  ;;  %v116_v2 = vmov 0   ;;  %v19_v3 = vld [vmem:[%s146_s1] sm:$0xff]  ;;  %v30_v9 = vlaneseq  ;;  %vm57_vm6 = vcmask 7168  }
   0x3   :  { %97 = vset.pattern.permute.xlu0 %v116_v2  ;;  %s82_s13 = sshll.u32 %s147_s2, 4  ;;  %s117_s16 = smov [#allocation2]   ;;  %s83_s13 = int_to_ptr.hbm [resolvable:$true] %s82_s13 }
   0x4   :  { %22 = vmax.xlane.f32.xlu0 %v21_v1  ;;  %v31_v10 = vand.u32 127, %v30_v9 }
  0x18   :  { %33 = vperm.xlu0 %97, %v19_v3  }
  0x77   :  { %v23_v4 = vpop.xlane.xlu0 %22 }
  0x78   :  { %v24_v5 = vsub.f32 %v18_v0, %v23_v4 }
  0x7a   :  { %v25_v6 = vmul.f32 1.442695, %v24_v5 }
  0x7c   :  { %98 = vpow2.f32 %v25_v6 }
  0x82   :  { %v99_v7 = vpop.eup %98 }
  0x83   :  { %v27_v8 = vsel %vm20_vm0, %v99_v7, 0.0 }
  0x84   :  { %28 = vadd.xlane.f32.xlu1 %v27_v8 }
  0x8a   :  { %v34_v11 = vpop.permute.xlu0 %33 }
  0x8b   :  { %vm35_vm1 = vcmp.eq.s32.totalorder %v31_v10, %v34_v11 }
  0x8c   :  { %v36_v12 = vsel %vm35_vm1, %v99_v7, 0.0 }
  0x8d   :  { %v37_v13 = vsel %vm20_vm0, %v36_v12, 0.0 }
  0x8e   :  { %38 = vadd.xlane.f32.xlu1 %v37_v13 }
  0xf7   :  { %v29_v14 = vpop.xlane.xlu1 %28 }
  0xf8   :  { %100 = vrcp.f32 %v29_v14  ;;  %v51_v18 = vand.u32 2147483648, %v29_v14  ;;  %v49_v20 = vand.u32 2147483647, %v29_v14  ;;  %vm45_vm3 = vweird.f32 %v29_v14 }
  0xfa   :  { %v52_v22 = vor.u32 1.1754944e-38, %v51_v18  ;;  %vm50_vm5 = vcmp.eq.f32.partialorder %v49_v20, 8.507059e+37 }
  0xfe   :  { %v101_v15 = vpop.eup %100 }
  0xff   :  { %v41_v16 = vmul.f32 %v101_v15, %v29_v14  ;;  %vm46_vm2 = vweird.f32 %v101_v15 }
 0x100   :  { %vm47_vm4 = vmor %vm45_vm3, %vm46_vm2 }
 0x101   :  { %v42_v17 = vsub.f32 1.0, %v41_v16  ;;  %v39_v25 = vpop.xlane.xlu1 %38 }
 0x103   :  { %v43_v19 = vmul.f32 %v101_v15, %v42_v17 }
 0x105   :  { %v44_v21 = vadd.f32 %v101_v15, %v43_v19 }
 0x107   :  { %v48_v23 = vsel %vm47_vm4, %v101_v15, %v44_v21 }
 0x108   :  { %v53_v24 = vsel %vm50_vm5, %v52_v22, %v48_v23 }
 0x109   :  { %v54_v26 = vmul.f32 %v53_v24, %v39_v25 }
 0x10b   :  { %v55_v27 = vsub.f32 1.0, %v54_v26 }
 0x10d   :  { %v58_v28 = vsel %vm57_vm6, %v55_v27, 0.0 }
 0x10e   :  { %59 = vadd.xlane.f32.xlu2 %v58_v28 }
 0x181   :  { %v60_v29 = vpop.xlane.xlu2 %59 }
 0x182   :  { %v61_v30 = vrot.slane %v60_v29, 4 }
 0x184   :  { %v62_v31 = vadd.f32 %v61_v30, %v60_v29 }
 0x186   :  { %v63_v32 = vrot.slane %v62_v31, 2 }
 0x188   :  { %v64_v33 = vadd.f32 %v63_v32, %v62_v31 }
 0x18a   :  { %v65_v34 = vrot.slane %v64_v33, 1 }
 0x18c   :  { %v66_v35 = vadd.f32 %v65_v34, %v64_v33 }
 0x18e   :  { %92 = vpush %v66_v35 }
 0x1bf   :  { %s93_s14 = spop %92 }
 0x1c0   :  { %s75_s15 = smul.f32 0.25, %s93_s14 }
 0x1c2   :  { %76 = sst [smem:[#allocation2]] %s75_s15 }
 0x1c3   :  { %85 = dma.smem_to_hbm %s117_s16, 16, %s83_s13, [#allocation3]  }
 0x1c4   :  { %114 = dma.done.wait [#allocation3], 16  }
 0x1c5   :  { %115 = vsyncadd [#allocation3], 4294967280 }
 0x1c6   :  { %90 = sfence }
 0x1c7   :  { %91 = vsyncpa [#allocation3], 1 }

</bundles_post_ra>
